<compile_context>
chip_gen: v7x
topology: tpu7x:2x2x1
jax: 0.10.0
libtpu: 0.0.40
codegen_flags: <defaults>
</compile_context>

<pallas_src>
import jax
import jax.numpy as jnp
from jax.experimental import pallas as pl
from jax.experimental.pallas import tpu as pltpu

_MiB = 1024 * 1024


def fir_kernel(x_ref, w_ref, o_ref):
    """o[r, i] = sum_m x[r, i + m] * w[r, m]  (valid i only).

    x_ref: (Rblk, L)  rows = flattened (n, c); each row holds H back-to-back
                      FIR segments of length W along the lane axis.
    w_ref: (Rblk, M)  per-row taps (VMEM tile, vector-broadcast per tap).
    o_ref: (Rblk, L)  full-width lane-dense store.  Within each W-segment only
                      the first W_out = W - M + 1 lanes are valid; the rest
                      (including anything touched by the circular roll wrap)
                      is garbage and MUST be sliced off by the consumer.  If
                      that slicing ever changes (e.g. 'same' conv), the wrapped
                      lanes become real wrong values.
    """
    xf = x_ref[...].astype(jnp.float32)
    w = w_ref[...].astype(jnp.float32)
    M = w.shape[-1]
    L = xf.shape[-1]

    acc = xf * w[:, 0:1]                        # tap 0 seeds the accumulator
    for m in range(1, M):                       # static unroll; M is small
        # roll by L - m == roll by -m: lane i picks up x[i + m] (XLU slot).
        acc = acc + pltpu.roll(xf, L - m, axis=1) * w[:, m:m + 1]
    o_ref[...] = acc.astype(o_ref.dtype)


def _vmem_plan():
    """(per-step footprint budget, vmem_limit_bytes) per TPU generation."""
    try:
        kind = jax.devices()[0].device_kind.lower()
    except Exception:
        kind = ""
    if "v7" in kind:
        # 64 MiB physical / 32 MiB scoped default: keep footprint small-ish.
        return 16 * _MiB, 48 * _MiB
    if "v6" in kind:
        # 128 MiB physical: raise the limit and run big blocks to amortize the
        # ~0.35 us per-grid-step overhead.
        return 48 * _MiB, 100 * _MiB
    # v5e / unknown: conservative footprint, but raise the 16 MiB scoped
    # default a little so fp32 temps never cost the 2-deep pipeline.
    return 10 * _MiB, 32 * _MiB


def _pick_row_block(num_rows, lanes, in_itemsize, out_itemsize, budget_bytes,
                    target_steps=4):
    """Pick a row block (multiple of 8) such that:
       * the real per-step footprint (double-buffered in + out, plus ~4
         full-tile fp32 temps: xf / acc / rolled / headroom) fits the budget;
       * the 1-D parallel grid keeps >= target_steps steps when the row count
         allows it (v7x shards the parallel axis over 2 TensorCores);
       * ragged row counts never collapse to one giant untiled block.
    """
    bytes_per_row = lanes * (2 * in_itemsize + 2 * out_itemsize + 4 * 4)
    by_budget = max(8, (budget_bytes // max(bytes_per_row, 1)) // 8 * 8)
    by_steps = max(8, (pl.cdiv(num_rows, target_steps)) // 8 * 8)
    by_rows = max(8, pl.cdiv(num_rows, 8) * 8)
    return min(by_budget, by_steps, by_rows)


@jax.jit
def fir_cnn_forward(x, fir_weights):
    """Equivalent of FIRCNNModule.forward (depthwise Conv2d, kernel (1, M), no bias).

    x:           (N, C, H, W), C = 2*P
    fir_weights: (C, 1, 1, M)
    returns:     (N, C, H, W - M + 1)
    """
    N, C, H, W = x.shape
    M = fir_weights.shape[-1]
    W_out = W - M + 1
    L = H * W
    R = N * C

    # Free contiguous reshape (no copy): every row holds H full FIR segments
    # back-to-back.  No lane padding: the BlockSpec's last dim equals the full
    # array extent L, which satisfies the (8,128) rule even when L % 128 != 0.
    x_rows = x.reshape(R, L)

    # Per-row taps: channel-c taps replicated per batch element (tiny: R*M*4 B).
    w_rows = jnp.tile(fir_weights.reshape(C, M).astype(jnp.float32), (N, 1))

    in_isz = jnp.dtype(x.dtype).itemsize
    out_isz = in_isz
    budget_bytes, vmem_limit = _vmem_plan()
    rblk = _pick_row_block(R, L, in_isz, out_isz, budget_bytes)
    grid = (pl.cdiv(R, rblk),)   # ragged last row block is masked by Pallas

    cost = pl.CostEstimate(
        flops=(2 * M - 1) * R * L,
        bytes_accessed=R * L * (in_isz + out_isz) + R * M * 4,
        transcendentals=0)

    out_rows = pl.pallas_call(
        fir_kernel,
        out_shape=jax.ShapeDtypeStruct((R, L), x.dtype),
        grid=grid,
        in_specs=[
            pl.BlockSpec((rblk, L), lambda r: (r, 0)),
            pl.BlockSpec((rblk, M), lambda r: (r, 0)),
        ],
        out_specs=pl.BlockSpec((rblk, L), lambda r: (r, 0)),
        compiler_params=pltpu.CompilerParams(
            dimension_semantics=("parallel",),
            vmem_limit_bytes=vmem_limit),
        cost_estimate=cost,
    )(x_rows, w_rows)

    # Keep only the valid FIR outputs (first W_out columns of every W-segment).
    # This single strided-slice copy is the price of returning the module's
    # exact (N, C, H, W_out) layout; consumers that can work on the packed
    # (N*C, H*W) layout should take `out_rows` directly and skip it.
    # NOTE: for very large H*W one would additionally sub-tile the lane axis
    # (chunks aligned to multiples of W) to shrink the in-kernel fp32 temps.
    return out_rows.reshape(N, C, H, W)[..., :W_out]


def fir_cnn_reference(x, fir_weights):
    """Pure-JAX reference (nn.Conv2d depthwise, kernel (1, M), cross-correlation)."""
    N, C, H, W = x.shape
    M = fir_weights.shape[-1]
    W_out = W - M + 1
    w = fir_weights.reshape(C, M)
    out = jnp.zeros((N, C, H, W_out), jnp.float32)
    for m in range(M):
        out = out + x[..., m:m + W_out].astype(jnp.float32) * w[None, :, None, m:m + 1]
    return out.astype(x.dtype)


if __name__ == "__main__":
    # Module config: P channels, M taps -> Conv2d(2P, 2P, kernel=(1, M), groups=2P)
    P = 2
    M = 4
    C = 2 * P
    N, H, W = 2, 8, 16

    key = jax.random.PRNGKey(0)
    kx, kw = jax.random.split(key)
    x = jax.random.normal(kx, (N, C, H, W), dtype=jnp.float32)
    # Deterministic synthetic FIR weights, same shape as the torch Conv2d weight.
    fir_weights = jax.random.normal(kw, (C, 1, 1, M), dtype=jnp.float32)

    out = jax.block_until_ready(fir_cnn_forward(x, fir_weights))

    ref = fir_cnn_reference(x, fir_weights)
    assert out.shape == (N, C, H, W - M + 1), out.shape
    assert jnp.allclose(out, ref, atol=1e-5, rtol=1e-5), "mismatch vs reference"

    print("KERNEL_OK")
</pallas_src>

<mosaic_0001>
module attributes {stable_mosaic.version = 11 : i64} {
  func.func @fir_kernel(%arg0: i32, %arg1: memref<8x128xf32, #tpu.memory_space<vmem>>, %arg2: memref<8x4xf32, #tpu.memory_space<vmem>>, %arg3: memref<8x128xf32, #tpu.memory_space<vmem>>) attributes {dimension_semantics = [#tpu.dimension_semantics<parallel>], iteration_bounds = array<i64: 1>, scalar_prefetch = 0 : i64, scratch_operands = 0 : i64, tpu.core_type = #tpu.core_type<tc>, window_params = [{transform_indices = @transform_0, window_bounds = array<i64: 8, 128>}, {transform_indices = @transform_1, window_bounds = array<i64: 8, 4>}, {transform_indices = @transform_2, window_bounds = array<i64: 8, 128>}]} {
    %c0 = arith.constant 0 : index
    %c0_0 = arith.constant 0 : index
    %0 = vector.load %arg1[%c0, %c0_0] : memref<8x128xf32, #tpu.memory_space<vmem>>, vector<8x128xf32>
    %c0_1 = arith.constant 0 : index
    %c0_2 = arith.constant 0 : index
    %1 = vector.load %arg2[%c0_1, %c0_2] : memref<8x4xf32, #tpu.memory_space<vmem>>, vector<8x4xf32>
    %2 = vector.extract_strided_slice %1 {offsets = [0, 0], sizes = [8, 1], strides = [1, 1]} : vector<8x4xf32> to vector<8x1xf32>
    %3 = vector.broadcast %2 : vector<8x1xf32> to vector<8x128xf32>
    %4 = arith.mulf %0, %3 : vector<8x128xf32>
    %c127_i32 = arith.constant 127 : i32
    %5 = tpu.dynamic_rotate %0 by %c127_i32 dim 1 : vector<8x128xf32>, i32 -> vector<8x128xf32>
    %6 = vector.extract_strided_slice %1 {offsets = [0, 1], sizes = [8, 1], strides = [1, 1]} : vector<8x4xf32> to vector<8x1xf32>
    %7 = vector.broadcast %6 : vector<8x1xf32> to vector<8x128xf32>
    %8 = arith.mulf %5, %7 : vector<8x128xf32>
    %9 = arith.addf %4, %8 : vector<8x128xf32>
    %c126_i32 = arith.constant 126 : i32
    %10 = tpu.dynamic_rotate %0 by %c126_i32 dim 1 : vector<8x128xf32>, i32 -> vector<8x128xf32>
    %11 = vector.extract_strided_slice %1 {offsets = [0, 2], sizes = [8, 1], strides = [1, 1]} : vector<8x4xf32> to vector<8x1xf32>
    %12 = vector.broadcast %11 : vector<8x1xf32> to vector<8x128xf32>
    %13 = arith.mulf %10, %12 : vector<8x128xf32>
    %14 = arith.addf %9, %13 : vector<8x128xf32>
    %c125_i32 = arith.constant 125 : i32
    %15 = tpu.dynamic_rotate %0 by %c125_i32 dim 1 : vector<8x128xf32>, i32 -> vector<8x128xf32>
    %16 = vector.extract_strided_slice %1 {offsets = [0, 3], sizes = [8, 1], strides = [1, 1]} : vector<8x4xf32> to vector<8x1xf32>
    %17 = vector.broadcast %16 : vector<8x1xf32> to vector<8x128xf32>
    %18 = arith.mulf %15, %17 : vector<8x128xf32>
    %19 = arith.addf %14, %18 : vector<8x128xf32>
    %c0_3 = arith.constant 0 : index
    %c0_4 = arith.constant 0 : index
    %20 = vector.load %arg3[%c0_3, %c0_4] : memref<8x128xf32, #tpu.memory_space<vmem>>, vector<8x128xf32>
    tpu.vector_store %arg3[%c0_3, %c0_4], %19 {strides = array<i32>} : memref<8x128xf32, #tpu.memory_space<vmem>>, vector<8x128xf32>,
    return
  }
  func.func @transform_0(%arg0: i32) -> (i32, i32) {
    %c0_i32 = arith.constant 0 : i32
    %c0_i32_0 = arith.constant 0 : i32
    return %arg0, %c0_i32 : i32, i32
  }
  func.func @transform_1(%arg0: i32) -> (i32, i32) {
    %c0_i32 = arith.constant 0 : i32
    %c0_i32_0 = arith.constant 0 : i32
    return %arg0, %c0_i32 : i32, i32
  }
  func.func @transform_2(%arg0: i32) -> (i32, i32) {
    %c0_i32 = arith.constant 0 : i32
    %c0_i32_0 = arith.constant 0 : i32
    return %arg0, %c0_i32 : i32, i32
  }
}

</mosaic_0001>

<bundles_post_ra>
// kernel: fir_cnn_forward.1
= control target key start
LH: loop header
LB: loop body
LE: loop exit
PB: predicated region body
PF: predicated region fallthrough
CT: control target
= control target key end

     0   :  { %v60_v0 = vmov 2   ;;  %v61_v1 = vmov 0   ;;  %v62_v3 = vmov 3   ;;  %v63_v4 = vmov 1   ;;  %s64_s13 = smov 126   ;;  %s65_s14 = smov 127   ;;  %s91_s1 = inlined_call_operand.vmem [shape: f32[8,4], index: 1, kind: input, shape index: {}]   ;;  %s92_s0 = inlined_call_operand.vmem [shape: f32[8,128], index: 0, kind: input, shape index: {}]   ;;  %s93_s2 = inlined_call_operand.vmem [shape: f32[8,128], index: 2, kind: output, shape index: {}]  }
   0x1   :  { %57 = vset.pattern.permute.xlu1 %v60_v0  ;;  %55 = vset.pattern.permute.xlu0 %v61_v1  ;;  %v12_v2 = vld [vmem:[%s91_s1] sm:$0xff]  ;;  %s66_s15 = smov 125  }
   0x2   :  { %30 = vperm.xlu1 %57, %v12_v2   ;;  %15 = vperm.xlu0 %55, %v12_v2   ;;  %v11_v5 = vld [vmem:[%s92_s0] sm:$0xff] }
   0x6   :  { %58 = vset.pattern.permute.xlu1 %v62_v3  ;;  %56 = vset.pattern.permute.xlu0 %v63_v4 }
   0x7   :  { %38 = vperm.xlu1 %58, %v12_v2   ;;  %22 = vperm.xlu0 %56, %v12_v2  }
   0xb   :  { %27 = vrot.lane.b32.xlu0 %v11_v5, %s64_s13  ;;  %19 = vrot.lane.b32.xlu1 %v11_v5, %s65_s14 }
   0xc   :  { %59 = vset.pattern.permute.xlu0 %v62_v3 }
   0xf   :  { %35 = vrot.lane.b32.xlu1 %v11_v5, %s66_s15 }
  0x81   :  { %v31_v6 = vpop.permute.xlu1 %30  ;;  %v16_v7 = vpop.permute.xlu0 %15 }
  0x82   :  { %v18_v12 = vmul.f32 %v16_v7, %v11_v5 }
  0x86   :  { %v39_v8 = vpop.permute.xlu1 %38  ;;  %v23_v9 = vpop.permute.xlu0 %22 }
  0x8a   :  { %v28_v10 = vpop.permute.xlu0 %27  ;;  %v20_v11 = vpop.permute.xlu1 %19 }
  0x8b   :  { %v25_v13 = vmul.f32 %v23_v9, %v20_v11  ;;  %v33_v14 = vmul.f32 %v31_v6, %v28_v10 }
  0x8d   :  { %v26_v15 = vadd.f32 %v25_v13, %v18_v12 }
  0x8e   :  { %v36_v16 = vpop.permute.xlu1 %35 }
  0x8f   :  { %v34_v17 = vadd.f32 %v33_v14, %v26_v15  ;;  %v41_v18 = vmul.f32 %v39_v8, %v36_v16 }
  0x91   :  { %v42_v19 = vadd.f32 %v41_v18, %v34_v17 }
  0x93   :  { %43 = vst [vmem:[%s93_s2] sm:$0xff] %v42_v19 }

</bundles_post_ra>
